<compile_context>
chip_gen: v5e
topology: v5e:2x2
jax: 0.10.0
libtpu: 0.0.40
codegen_flags: <defaults>
</compile_context>

<pallas_src>
import jax
import jax.numpy as jnp
from jax.experimental import pallas as pl
from jax.experimental.pallas import tpu as pltpu

BN_EPS = 1e-5
PAD_IN = 16     # padded (state features + folded-bias ones column) width
HID_PAD = 64    # padded hidden width (50 -> 64)
WIDE = 128      # fc1/fc2 width and lane-dense output width


def _bn_relu(z, gamma, beta):
    # PyTorch training-mode BatchNorm1d (per-batch mean, biased variance,
    # eps=1e-5) fused into a single affine.  sum(z) and sum(z*z) are
    # independent reductions so they can pipeline in the XLU.
    inv_n = 1.0 / z.shape[0]
    s1 = jnp.sum(z, axis=0, keepdims=True)
    s2 = jnp.sum(z * z, axis=0, keepdims=True)
    mean = s1 * inv_n
    var = s2 * inv_n - mean * mean
    scale = gamma * jax.lax.rsqrt(var + BN_EPS)
    shift = beta - mean * scale
    return jnp.maximum(z * scale + shift, 0.0)


def net_kernel(x_ref, w0_ref, vecs_ref, w1_hbm, w2_hbm, w3_hbm, o_ref,
               w1_vmem, w2_vmem, w3_vmem, sem):
    # Kick off the later-layer weight fetches immediately so they overlap with
    # the earlier layers' matmuls + BN (DMA/latency-bound kernel).
    cp1 = pltpu.make_async_copy(w1_hbm, w1_vmem, sem.at[0])
    cp2 = pltpu.make_async_copy(w2_hbm, w2_vmem, sem.at[1])
    cp3 = pltpu.make_async_copy(w3_hbm, w3_vmem, sem.at[2])
    cp1.start(); cp2.start(); cp3.start()

    bf16 = jnp.bfloat16
    vecs = vecs_ref[...]                      # (8, 128) f32: g1, be1, g2, be2, b3, 0...
    g1, be1 = vecs[0:1, :], vecs[1:2, :]
    g2, be2 = vecs[2:3, :], vecs[3:4, :]
    b3 = vecs[4:5, :]

    # fc_initial + ReLU.  b0 is folded into w0 via the ones column of x_pad,
    # so the dot already includes the bias.  bf16 operands, f32 accumulation.
    h = jnp.maximum(
        jnp.dot(x_ref[...].astype(bf16), w0_ref[...],
                preferred_element_type=jnp.float32), 0.0)

    # fc1 + bn1 + ReLU.  (fc1 bias omitted: training-mode BN is invariant to a
    # per-feature constant added before normalisation.)
    cp1.wait()
    z1 = jnp.dot(h.astype(bf16), w1_vmem[...], preferred_element_type=jnp.float32)
    h1 = _bn_relu(z1, g1, be1)

    # fc2 + bn2 + ReLU  (fc2 bias omitted, same BN invariance).
    cp2.wait()
    z2 = jnp.dot(h1.astype(bf16), w2_vmem[...], preferred_element_type=jnp.float32)
    h2 = _bn_relu(z2, g2, be2)

    # fc3 (Q-values): lane-dense 128-wide store; real columns sliced outside.
    cp3.wait()
    o_ref[...] = jnp.dot(h2.astype(bf16), w3_vmem[...],
                         preferred_element_type=jnp.float32) + b3


def net_forward(x, packed, action_size):
    """x: (B, state_size) float32. packed: dict from pack_params()."""
    B, state_size = x.shape
    # State features + a ones column (folded fc_initial bias), zero-padded.
    x_pad = jnp.zeros((B, PAD_IN), jnp.float32)
    x_pad = x_pad.at[:, :state_size].set(x).at[:, state_size].set(1.0)

    vmem = pl.BlockSpec(memory_space=pltpu.MemorySpace.VMEM)
    hbm = pl.BlockSpec(memory_space=pl.ANY)

    weight_bytes = 2 * (PAD_IN * HID_PAD + HID_PAD * WIDE + WIDE * WIDE + WIDE * WIDE)
    cost = pl.CostEstimate(
        flops=2 * B * (PAD_IN * HID_PAD + HID_PAD * WIDE + WIDE * WIDE + WIDE * WIDE)
              + 40 * B * WIDE,
        transcendentals=2 * WIDE,                         # two per-feature rsqrt
        bytes_accessed=B * PAD_IN * 4 + 8 * WIDE * 4 + B * WIDE * 4 + weight_bytes,
    )

    out_pad = pl.pallas_call(
        net_kernel,
        out_shape=jax.ShapeDtypeStruct((B, WIDE), jnp.float32),
        grid=(),
        in_specs=[vmem, vmem, vmem, hbm, hbm, hbm],
        out_specs=vmem,
        scratch_shapes=[
            pltpu.VMEM((HID_PAD, WIDE), jnp.bfloat16),
            pltpu.VMEM((WIDE, WIDE), jnp.bfloat16),
            pltpu.VMEM((WIDE, WIDE), jnp.bfloat16),
            pltpu.SemaphoreType.DMA((3,)),
        ],
        cost_estimate=cost,
    )(x_pad, packed["w0"], packed["vecs"], packed["w1"], packed["w2"], packed["w3"])

    return out_pad[:, :action_size]


def init_params(key, state_size, action_size, hidden_size=50):
    """Deterministic synthetic init (PyTorch-like uniform fan-in scaling).

    Weights are stored transposed, i.e. (in_features, out_features), so the
    forward computes x @ W + b (== PyTorch x @ W.T + b).
    """
    def linear(key, fan_in, fan_out):
        k_w, k_b = jax.random.split(key)
        bound = 1.0 / jnp.sqrt(fan_in)
        w = jax.random.uniform(k_w, (fan_in, fan_out), jnp.float32, -bound, bound)
        b = jax.random.uniform(k_b, (1, fan_out), jnp.float32, -bound, bound)
        return w, b

    k0, k1, k2, k3 = jax.random.split(key, 4)
    w0, b0 = linear(k0, state_size, hidden_size)
    w1, b1 = linear(k1, hidden_size, 128)
    w2, b2 = linear(k2, 128, 128)
    w3, b3 = linear(k3, 128, action_size)

    return dict(
        w0=w0, b0=b0,
        w1=w1, b1=b1,
        g1=jnp.ones((1, 128), jnp.float32), be1=jnp.zeros((1, 128), jnp.float32),
        w2=w2, b2=b2,
        g2=jnp.ones((1, 128), jnp.float32), be2=jnp.zeros((1, 128), jnp.float32),
        w3=w3, b3=b3,
    )


def pack_params(p):
    """Pack weights for the kernel: fold b0 into w0 (extra row matching the
    ones column of x_pad), zero-pad to the trimmed tile sizes, cast to bf16,
    and pack the remaining per-feature vectors into one (8,128) f32 array."""
    def pad_to(w, shape):
        out = jnp.zeros(shape, jnp.float32)
        return out.at[:w.shape[0], :w.shape[1]].set(w)

    w0_aug = jnp.concatenate([p["w0"], p["b0"]], axis=0)            # (state+1, hid)
    w0p = pad_to(w0_aug, (PAD_IN, HID_PAD)).astype(jnp.bfloat16)
    w1p = pad_to(p["w1"], (HID_PAD, WIDE)).astype(jnp.bfloat16)     # b1 dropped (BN)
    w2p = pad_to(p["w2"], (WIDE, WIDE)).astype(jnp.bfloat16)        # b2 dropped (BN)
    w3p = pad_to(p["w3"], (WIDE, WIDE)).astype(jnp.bfloat16)

    def pad1(v):
        v = jnp.asarray(v).reshape(-1)
        return jnp.zeros((WIDE,), jnp.float32).at[:v.shape[0]].set(v)

    zero = jnp.zeros((WIDE,), jnp.float32)
    vecs = jnp.stack([pad1(p["g1"]), pad1(p["be1"]),
                      pad1(p["g2"]), pad1(p["be2"]),
                      pad1(p["b3"]), zero, zero, zero], axis=0)     # (8, 128)

    return dict(w0=w0p, w1=w1p, w2=w2p, w3=w3p, vecs=vecs)


def reference_forward(x, p):
    """Pure-f32 JAX reference of the PyTorch forward (training-mode BN)."""
    def bn_relu(z, g, b):
        m = jnp.mean(z, axis=0, keepdims=True)
        v = jnp.mean((z - m) ** 2, axis=0, keepdims=True)
        return jnp.maximum((z - m) / jnp.sqrt(v + BN_EPS) * g + b, 0.0)

    h = jnp.maximum(x @ p["w0"] + p["b0"], 0.0)
    h = bn_relu(h @ p["w1"] + p["b1"], p["g1"], p["be1"])
    h = bn_relu(h @ p["w2"] + p["b2"], p["g2"], p["be2"])
    return h @ p["w3"] + p["b3"]


def matched_reference(x, p):
    """Reference mirroring the kernel's numerics exactly: bf16 dot operands,
    f32 accumulation, bias folded / dropped, E[z^2]-mean^2 BN variance."""
    bf = jnp.bfloat16

    def mm(a, w):
        return jnp.dot(a.astype(bf), w.astype(bf), preferred_element_type=jnp.float32)

    def bn_relu(z, g, b):
        inv_n = 1.0 / z.shape[0]
        mean = jnp.sum(z, axis=0, keepdims=True) * inv_n
        var = jnp.sum(z * z, axis=0, keepdims=True) * inv_n - mean * mean
        scale = g * jax.lax.rsqrt(var + BN_EPS)
        return jnp.maximum(z * scale + (b - mean * scale), 0.0)

    x_aug = jnp.concatenate([x, jnp.ones((x.shape[0], 1), jnp.float32)], axis=1)
    w0_aug = jnp.concatenate([p["w0"], p["b0"]], axis=0)
    h = jnp.maximum(mm(x_aug, w0_aug), 0.0)
    h1 = bn_relu(mm(h, p["w1"]), p["g1"], p["be1"])
    h2 = bn_relu(mm(h1, p["w2"]), p["g2"], p["be2"])
    return mm(h2, p["w3"]) + p["b3"]


if __name__ == "__main__":
    # state_size = sum of observation_space shapes = 1+1+2+1+1+1+1+1+1 = 10
    # action_size = 3 (Discrete(3)), hidden_size = 50
    STATE_SIZE, ACTION_SIZE, HIDDEN = 10, 3, 50
    BATCH = 8

    key = jax.random.PRNGKey(0)
    k_params, k_x = jax.random.split(key)
    params = init_params(k_params, STATE_SIZE, ACTION_SIZE, HIDDEN)
    packed = pack_params(params)
    x = jax.random.normal(k_x, (BATCH, STATE_SIZE), jnp.float32)

    out = jax.block_until_ready(net_forward(x, packed, ACTION_SIZE))
    assert out.shape == (BATCH, ACTION_SIZE)

    # Tight check vs a reference with the kernel's exact numerics (bf16 dots).
    ref_bf16 = matched_reference(x, params)
    assert jnp.allclose(out, ref_bf16, atol=5e-3, rtol=5e-3), (out, ref_bf16)

    # Loose semantic check vs the pure-f32 PyTorch-style forward
    # (difference = bf16 weight/activation rounding only).
    ref_f32 = reference_forward(x, params)
    assert jnp.allclose(out, ref_f32, atol=1e-1, rtol=1e-1), (out, ref_f32)

    print("KERNEL_OK")
</pallas_src>

<mosaic_0001>
module attributes {stable_mosaic.version = 11 : i64} {
  func.func @net_kernel(%arg0: memref<8x16xf32, #tpu.memory_space<vmem>>, %arg1: memref<16x64xbf16, #tpu.memory_space<vmem>>, %arg2: memref<8x128xf32, #tpu.memory_space<vmem>>, %arg3: memref<64x128xbf16, #tpu.memory_space<any>>, %arg4: memref<128x128xbf16, #tpu.memory_space<any>>, %arg5: memref<128x128xbf16, #tpu.memory_space<any>>, %arg6: memref<8x128xf32, #tpu.memory_space<vmem>>, %arg7: memref<64x128xbf16, #tpu.memory_space<vmem>>, %arg8: memref<128x128xbf16, #tpu.memory_space<vmem>>, %arg9: memref<128x128xbf16, #tpu.memory_space<vmem>>, %arg10: memref<3x!tpu.dma_semaphore, #tpu.memory_space<semaphore_mem>>) attributes {dimension_semantics = [], scalar_prefetch = 0 : i64, scratch_operands = 4 : i64, tpu.core_type = #tpu.core_type<tc>} {
    %c0_i32 = arith.constant 0 : i32
    %0 = tpu.memref_slice %arg10[%c0_i32] : memref<3x!tpu.dma_semaphore, #tpu.memory_space<semaphore_mem>> -> memref<1x!tpu.dma_semaphore, #tpu.memory_space<semaphore_mem>>
    %1 = tpu.memref_squeeze %0 : memref<1x!tpu.dma_semaphore, #tpu.memory_space<semaphore_mem>> -> memref<!tpu.dma_semaphore, #tpu.memory_space<semaphore_mem>>
    tpu.enqueue_dma source(%arg3 : memref<64x128xbf16, #tpu.memory_space<any>>) target(%arg7 : memref<64x128xbf16, #tpu.memory_space<vmem>>) target_semaphore(%1 : memref<!tpu.dma_semaphore, #tpu.memory_space<semaphore_mem>>)
    %c1_i32 = arith.constant 1 : i32
    %2 = tpu.memref_slice %arg10[%c1_i32] : memref<3x!tpu.dma_semaphore, #tpu.memory_space<semaphore_mem>> -> memref<1x!tpu.dma_semaphore, #tpu.memory_space<semaphore_mem>>
    %3 = tpu.memref_squeeze %2 : memref<1x!tpu.dma_semaphore, #tpu.memory_space<semaphore_mem>> -> memref<!tpu.dma_semaphore, #tpu.memory_space<semaphore_mem>>
    tpu.enqueue_dma source(%arg4 : memref<128x128xbf16, #tpu.memory_space<any>>) target(%arg8 : memref<128x128xbf16, #tpu.memory_space<vmem>>) target_semaphore(%3 : memref<!tpu.dma_semaphore, #tpu.memory_space<semaphore_mem>>)
    %c2_i32 = arith.constant 2 : i32
    %4 = tpu.memref_slice %arg10[%c2_i32] : memref<3x!tpu.dma_semaphore, #tpu.memory_space<semaphore_mem>> -> memref<1x!tpu.dma_semaphore, #tpu.memory_space<semaphore_mem>>
    %5 = tpu.memref_squeeze %4 : memref<1x!tpu.dma_semaphore, #tpu.memory_space<semaphore_mem>> -> memref<!tpu.dma_semaphore, #tpu.memory_space<semaphore_mem>>
    tpu.enqueue_dma source(%arg5 : memref<128x128xbf16, #tpu.memory_space<any>>) target(%arg9 : memref<128x128xbf16, #tpu.memory_space<vmem>>) target_semaphore(%5 : memref<!tpu.dma_semaphore, #tpu.memory_space<semaphore_mem>>)
    %c0 = arith.constant 0 : index
    %c0_0 = arith.constant 0 : index
    %6 = vector.load %arg2[%c0, %c0_0] : memref<8x128xf32, #tpu.memory_space<vmem>>, vector<8x128xf32>
    %7 = vector.extract_strided_slice %6 {offsets = [0, 0], sizes = [1, 128], strides = [1, 1]} : vector<8x128xf32> to vector<1x128xf32>
    %8 = vector.extract_strided_slice %6 {offsets = [1, 0], sizes = [1, 128], strides = [1, 1]} : vector<8x128xf32> to vector<1x128xf32>
    %9 = vector.extract_strided_slice %6 {offsets = [2, 0], sizes = [1, 128], strides = [1, 1]} : vector<8x128xf32> to vector<1x128xf32>
    %10 = vector.extract_strided_slice %6 {offsets = [3, 0], sizes = [1, 128], strides = [1, 1]} : vector<8x128xf32> to vector<1x128xf32>
    %11 = vector.extract_strided_slice %6 {offsets = [4, 0], sizes = [1, 128], strides = [1, 1]} : vector<8x128xf32> to vector<1x128xf32>
    %c0_1 = arith.constant 0 : index
    %c0_2 = arith.constant 0 : index
    %12 = vector.load %arg0[%c0_1, %c0_2] : memref<8x16xf32, #tpu.memory_space<vmem>>, vector<8x16xf32>
    %13 = arith.truncf %12 : vector<8x16xf32> to vector<8x16xbf16>
    %c0_3 = arith.constant 0 : index
    %c0_4 = arith.constant 0 : index
    %14 = vector.load %arg1[%c0_3, %c0_4] : memref<16x64xbf16, #tpu.memory_space<vmem>>, vector<16x64xbf16>
    %cst = arith.constant dense<0.000000e+00> : vector<8x64xf32>
    %15 = tpu.matmul %13, %14, %cst {dimension_numbers = #tpu.dot_dimension_numbers<[1], [0], [0], [1], [0, 0, 1, 1], [], []>} : vector<8x16xbf16>, vector<16x64xbf16>, vector<8x64xf32> -> vector<8x64xf32>
    %cst_5 = arith.constant 0.000000e+00 : f32
    %16 = vector.broadcast %cst_5 : f32 to vector<8x64xf32>
    %17 = arith.maximumf %15, %16 : vector<8x64xf32>
    %c0_i32_6 = arith.constant 0 : i32
    %18 = tpu.memref_slice %arg10[%c0_i32_6] : memref<3x!tpu.dma_semaphore, #tpu.memory_space<semaphore_mem>> -> memref<1x!tpu.dma_semaphore, #tpu.memory_space<semaphore_mem>>
    %19 = tpu.memref_squeeze %18 : memref<1x!tpu.dma_semaphore, #tpu.memory_space<semaphore_mem>> -> memref<!tpu.dma_semaphore, #tpu.memory_space<semaphore_mem>>
    tpu.wait_dma2 semaphore(%19 : memref<!tpu.dma_semaphore, #tpu.memory_space<semaphore_mem>>) src(%arg3 : memref<64x128xbf16, #tpu.memory_space<any>>) dst(%arg7 : memref<64x128xbf16, #tpu.memory_space<vmem>>)
    %20 = arith.truncf %17 : vector<8x64xf32> to vector<8x64xbf16>
    %c0_7 = arith.constant 0 : index
    %c0_8 = arith.constant 0 : index
    %21 = vector.load %arg7[%c0_7, %c0_8] : memref<64x128xbf16, #tpu.memory_space<vmem>>, vector<64x128xbf16>
    %cst_9 = arith.constant dense<0.000000e+00> : vector<8x128xf32>
    %22 = tpu.matmul %20, %21, %cst_9 {dimension_numbers = #tpu.dot_dimension_numbers<[1], [0], [0], [1], [0, 0, 1, 1], [], []>} : vector<8x64xbf16>, vector<64x128xbf16>, vector<8x128xf32> -> vector<8x128xf32>
    %cst_10 = arith.constant dense<0.000000e+00> : vector<128xf32>
    %23 = vector.multi_reduction <add>, %22, %cst_10 [0] : vector<8x128xf32> to vector<128xf32>
    %24 = vector.shape_cast %23 : vector<128xf32> to vector<1x128xf32>
    %25 = arith.mulf %22, %22 : vector<8x128xf32>
    %cst_11 = arith.constant dense<0.000000e+00> : vector<128xf32>
    %26 = vector.multi_reduction <add>, %25, %cst_11 [0] : vector<8x128xf32> to vector<128xf32>
    %27 = vector.shape_cast %26 : vector<128xf32> to vector<1x128xf32>
    %cst_12 = arith.constant 1.250000e-01 : f32
    %28 = vector.broadcast %cst_12 : f32 to vector<1x128xf32>
    %29 = arith.mulf %24, %28 : vector<1x128xf32>
    %cst_13 = arith.constant 1.250000e-01 : f32
    %30 = vector.broadcast %cst_13 : f32 to vector<1x128xf32>
    %31 = arith.mulf %27, %30 : vector<1x128xf32>
    %32 = arith.mulf %29, %29 : vector<1x128xf32>
    %33 = arith.subf %31, %32 : vector<1x128xf32>
    %cst_14 = arith.constant 9.99999974E-6 : f32
    %34 = vector.broadcast %cst_14 : f32 to vector<1x128xf32>
    %35 = arith.addf %33, %34 : vector<1x128xf32>
    %36 = math.rsqrt %35 : vector<1x128xf32>
    %37 = arith.mulf %7, %36 : vector<1x128xf32>
    %38 = arith.mulf %29, %37 : vector<1x128xf32>
    %39 = arith.subf %8, %38 : vector<1x128xf32>
    %40 = vector.broadcast %37 : vector<1x128xf32> to vector<8x128xf32>
    %41 = arith.mulf %22, %40 : vector<8x128xf32>
    %42 = vector.broadcast %39 : vector<1x128xf32> to vector<8x128xf32>
    %43 = arith.addf %41, %42 : vector<8x128xf32>
    %cst_15 = arith.constant 0.000000e+00 : f32
    %44 = vector.broadcast %cst_15 : f32 to vector<8x128xf32>
    %45 = arith.maximumf %43, %44 : vector<8x128xf32>
    %c1_i32_16 = arith.constant 1 : i32
    %46 = tpu.memref_slice %arg10[%c1_i32_16] : memref<3x!tpu.dma_semaphore, #tpu.memory_space<semaphore_mem>> -> memref<1x!tpu.dma_semaphore, #tpu.memory_space<semaphore_mem>>
    %47 = tpu.memref_squeeze %46 : memref<1x!tpu.dma_semaphore, #tpu.memory_space<semaphore_mem>> -> memref<!tpu.dma_semaphore, #tpu.memory_space<semaphore_mem>>
    tpu.wait_dma2 semaphore(%47 : memref<!tpu.dma_semaphore, #tpu.memory_space<semaphore_mem>>) src(%arg4 : memref<128x128xbf16, #tpu.memory_space<any>>) dst(%arg8 : memref<128x128xbf16, #tpu.memory_space<vmem>>)
    %48 = arith.truncf %45 : vector<8x128xf32> to vector<8x128xbf16>
    %c0_17 = arith.constant 0 : index
    %c0_18 = arith.constant 0 : index
    %49 = vector.load %arg8[%c0_17, %c0_18] : memref<128x128xbf16, #tpu.memory_space<vmem>>, vector<128x128xbf16>
    %cst_19 = arith.constant dense<0.000000e+00> : vector<8x128xf32>
    %50 = tpu.matmul %48, %49, %cst_19 {dimension_numbers = #tpu.dot_dimension_numbers<[1], [0], [0], [1], [0, 0, 1, 1], [], []>} : vector<8x128xbf16>, vector<128x128xbf16>, vector<8x128xf32> -> vector<8x128xf32>
    %cst_20 = arith.constant dense<0.000000e+00> : vector<128xf32>
    %51 = vector.multi_reduction <add>, %50, %cst_20 [0] : vector<8x128xf32> to vector<128xf32>
    %52 = vector.shape_cast %51 : vector<128xf32> to vector<1x128xf32>
    %53 = arith.mulf %50, %50 : vector<8x128xf32>
    %cst_21 = arith.constant dense<0.000000e+00> : vector<128xf32>
    %54 = vector.multi_reduction <add>, %53, %cst_21 [0] : vector<8x128xf32> to vector<128xf32>
    %55 = vector.shape_cast %54 : vector<128xf32> to vector<1x128xf32>
    %cst_22 = arith.constant 1.250000e-01 : f32
    %56 = vector.broadcast %cst_22 : f32 to vector<1x128xf32>
    %57 = arith.mulf %52, %56 : vector<1x128xf32>
    %cst_23 = arith.constant 1.250000e-01 : f32
    %58 = vector.broadcast %cst_23 : f32 to vector<1x128xf32>
    %59 = arith.mulf %55, %58 : vector<1x128xf32>
    %60 = arith.mulf %57, %57 : vector<1x128xf32>
    %61 = arith.subf %59, %60 : vector<1x128xf32>
    %cst_24 = arith.constant 9.99999974E-6 : f32
    %62 = vector.broadcast %cst_24 : f32 to vector<1x128xf32>
    %63 = arith.addf %61, %62 : vector<1x128xf32>
    %64 = math.rsqrt %63 : vector<1x128xf32>
    %65 = arith.mulf %9, %64 : vector<1x128xf32>
    %66 = arith.mulf %57, %65 : vector<1x128xf32>
    %67 = arith.subf %10, %66 : vector<1x128xf32>
    %68 = vector.broadcast %65 : vector<1x128xf32> to vector<8x128xf32>
    %69 = arith.mulf %50, %68 : vector<8x128xf32>
    %70 = vector.broadcast %67 : vector<1x128xf32> to vector<8x128xf32>
    %71 = arith.addf %69, %70 : vector<8x128xf32>
    %cst_25 = arith.constant 0.000000e+00 : f32
    %72 = vector.broadcast %cst_25 : f32 to vector<8x128xf32>
    %73 = arith.maximumf %71, %72 : vector<8x128xf32>
    %c2_i32_26 = arith.constant 2 : i32
    %74 = tpu.memref_slice %arg10[%c2_i32_26] : memref<3x!tpu.dma_semaphore, #tpu.memory_space<semaphore_mem>> -> memref<1x!tpu.dma_semaphore, #tpu.memory_space<semaphore_mem>>
    %75 = tpu.memref_squeeze %74 : memref<1x!tpu.dma_semaphore, #tpu.memory_space<semaphore_mem>> -> memref<!tpu.dma_semaphore, #tpu.memory_space<semaphore_mem>>
    tpu.wait_dma2 semaphore(%75 : memref<!tpu.dma_semaphore, #tpu.memory_space<semaphore_mem>>) src(%arg5 : memref<128x128xbf16, #tpu.memory_space<any>>) dst(%arg9 : memref<128x128xbf16, #tpu.memory_space<vmem>>)
    %76 = arith.truncf %73 : vector<8x128xf32> to vector<8x128xbf16>
    %c0_27 = arith.constant 0 : index
    %c0_28 = arith.constant 0 : index
    %77 = vector.load %arg9[%c0_27, %c0_28] : memref<128x128xbf16, #tpu.memory_space<vmem>>, vector<128x128xbf16>
    %cst_29 = arith.constant dense<0.000000e+00> : vector<8x128xf32>
    %78 = tpu.matmul %76, %77, %cst_29 {dimension_numbers = #tpu.dot_dimension_numbers<[1], [0], [0], [1], [0, 0, 1, 1], [], []>} : vector<8x128xbf16>, vector<128x128xbf16>, vector<8x128xf32> -> vector<8x128xf32>
    %79 = vector.broadcast %11 : vector<1x128xf32> to vector<8x128xf32>
    %80 = arith.addf %78, %79 : vector<8x128xf32>
    %c0_30 = arith.constant 0 : index
    %c0_31 = arith.constant 0 : index
    %81 = vector.load %arg6[%c0_30, %c0_31] : memref<8x128xf32, #tpu.memory_space<vmem>>, vector<8x128xf32>
    tpu.vector_store %arg6[%c0_30, %c0_31], %80 {strides = array<i32>} : memref<8x128xf32, #tpu.memory_space<vmem>>, vector<8x128xf32>,
    return
  }
}

</mosaic_0001>

<bundles_post_ra>
// kernel: tpu_custom_call.1
= control target key start
LH: loop header
LB: loop body
LE: loop exit
PB: predicated region body
PF: predicated region fallthrough
CT: control target
= control target key end

     0   :  { %11 = vsyncpa [#allocation7], 0  ;;  %s841_s0 = inlined_call_operand.hbm [shape: f32[8,16], index: 0, kind: input, shape index: {}]   ;;  %s842_s1 = inlined_call_operand.hbm [shape: bf16[16,64], index: 1, kind: input, shape index: {}]   ;;  %s843_s2 = inlined_call_operand.hbm [shape: f32[8,128], index: 2, kind: input, shape index: {}]   ;;  %s844_s3 = inlined_call_operand.hbm [shape: bf16[64,128], index: 3, kind: input, shape index: {}]   ;;  %s845_s4 = inlined_call_operand.hbm [shape: bf16[128,128], index: 4, kind: input, shape index: {}]   ;;  %s846_s5 = inlined_call_operand.hbm [shape: bf16[128,128], index: 5, kind: input, shape index: {}]   ;;  %s847_s6 = inlined_call_operand.hbm [shape: f32[8,128], index: 6, kind: output, shape index: {}]  }
   0x1   :  { %12 = vsyncpa [#allocation10], 0  ;;  %s29_s23 = sshll.u32 %s842_s1, 4  ;;  %s30_s23 = int_to_ptr.hbm [resolvable:$true] %s29_s23 }
   0x2   :  { %13 = vsyncpa [#allocation8], 0  ;;  %s769_s24 = smov [#allocation9]   ;;  %s19_s28 = sshll.u32 %s841_s0, 4  ;;  %s20_s28 = int_to_ptr.hbm [resolvable:$true] %s19_s28 }
   0x3   :  { %s31_s25 = sshll.u32 %s769_s24, 4  ;;  %s770_s29 = smov 64   ;;  %s32_s25 = int_to_ptr.vmem [resolvable:$true] %s31_s25 }
   0x4   :  { %s771_s30 = smov 4   ;;  %s772_s7 = smov [#allocation6]  }
   0x5   :  { %37 = dma.hbm_to_vmem [thread:$0]  %s30_s23, 128, %s32_s25, [#allocation10], %s770_s29, %s770_s29, %s771_s30  }
   0x6   :  { %s21_s8 = sshll.u32 %s772_s7, 4  ;;  %s43_s11 = sshll.u32 %s843_s2, 4  ;;  %s22_s8 = int_to_ptr.vmem [resolvable:$true] %s21_s8  ;;  %s44_s11 = int_to_ptr.hbm [resolvable:$true] %s43_s11 }
   0x7   :  { %24 = dma.hbm_to_vmem [thread:$0]  %s20_s28, 128, %s22_s8, [#allocation7]  }
   0x8   :  { %s773_s1 = smov [#allocation11]  }
   0x9   :  { %s45_s12 = sshll.u32 %s773_s1, 4  ;;  %s46_s12 = int_to_ptr.vmem [resolvable:$true] %s45_s12 }
   0xa   :  { %48 = dma.hbm_to_vmem [thread:$0]  %s44_s11, 128, %s46_s12, [#allocation10]  }
   0xb   :  { %757 = dma.done.wait [#allocation7], 128  }
   0xc   :  { %758 = vsyncadd [#allocation7], 4294967168 }
   0xd   :  { %759 = dma.done.wait [#allocation10], 256  }
   0xe   :  { %760 = vsyncadd [#allocation10], 4294967040  ;;  %v822_v0 = vld [vmem:[#allocation11] sm:$0xff]  ;;  %v555_v1 = vld [vmem:[#allocation9] sm:$0xff]  ;;  %vm114_vm0 = vcmask 130048   ;;  %s69_s13 = sshll.u32 %s844_s3, 4  ;;  %s70_s13 = int_to_ptr.hbm [resolvable:$true] %s69_s13 }
   0xf   :  { %v104_v2 = vld [vmem:[#allocation6] sm:$0xff]  ;;  %125 = vmatpush.bf16.msra.mxu0 %v555_v1  ;;  %s774_s14 = smov [#allocation2]   ;;  %s83_s18 = sshll.u32 %s845_s4, 4  ;;  %s84_s18 = int_to_ptr.hbm [resolvable:$true] %s83_s18 }
  0x10   :  { %v105_v3 = vpack.c.bf16 %v104_v2, %v104_v2  ;;  %s71_s15 = sshll.u32 %s774_s14, 4  ;;  %s775_s19 = smov [#allocation3]   ;;  %s72_s15 = int_to_ptr.vmem [resolvable:$true] %s71_s15 }
  0x11   :  { %74 = dma.hbm_to_vmem [thread:$0]  %s70_s13, 512, %s72_s15, [#allocation5] }
  0x12   :  { %470 = vmatmul.msk.bf16.vlgmr.msra.gmra.mxu0 %vm114_vm0, %v105_v3  ;;  %s85_s20 = sshll.u32 %s775_s19, 4  ;;  %s97_s23 = sshll.u32 %s846_s5, 4  ;;  %s86_s20 = int_to_ptr.vmem [resolvable:$true] %s85_s20  ;;  %s98_s23 = int_to_ptr.hbm [resolvable:$true] %s97_s23 }
  0x13   :  { %88 = dma.hbm_to_vmem [thread:$0]  %s84_s18, 1024, %s86_s20, [#allocation5 + $0x1] }
  0x14   :  { %s776_s3 = smov [#allocation4]  }
  0x15   :  { %s99_s24 = sshll.u32 %s776_s3, 4  ;;  %s100_s24 = int_to_ptr.vmem [resolvable:$true] %s99_s24 }
  0x16   :  { %102 = dma.hbm_to_vmem [thread:$0]  %s98_s23, 1024, %s100_s24, [#allocation5 + $0x2] }
  0x8f   :  { %v127_v4 = vpop.f32.mrf.mxu0 }
  0x90   :  { %v131_v5 = vmax.f32 %v127_v4, 0.0 }
  0x97   :  { %v129_v6 = vpop.f32.mrf.mxu0 }
  0x98   :  { %761 = dma.done.wait [#allocation5], 512 }
  0x99   :  { %762 = vsyncadd [#allocation5], 4294966784  ;;  %v559_v7 = vld [vmem:[#allocation2 + $0x18] sm:$0xff]  ;;  %v558_v8 = vld [vmem:[#allocation2 + $0x10] sm:$0xff]  ;;  %v136_v11 = vpack.c.bf16 %v131_v5, %v131_v5  ;;  %vm169_vm1 = vcmask 523264  }
  0x9a   :  { %177 = vmatpush.bf16.msra.mxu1 %v559_v7  ;;  %v557_v9 = vld [vmem:[#allocation2 + $0x8] sm:$0xff]  ;;  %v556_v10 = vld [vmem:[#allocation2] sm:$0xff] }
  0x9e   :  { %178 = vmatpush.bf16.msra.mxu1 %v558_v8 }
  0xa2   :  { %179 = vmatpush.bf16.msra.mxu1 %v557_v9 }
  0xa6   :  { %180 = vmatpush.bf16.msra.mxu1 %v556_v10 }
  0xa9   :  { %487 = vmatmul.msk.bf16.vlgmr.msra.gmra.mxu1 %vm169_vm1, %v136_v11 }
 0x126   :  { %v182_v12 = vpop.f32.mrf.mxu1 }
 0x127   :  { %v186_v13 = vrot.slane %v182_v12, 4  ;;  %v192_v14 = vmul.f32 %v182_v12, %v182_v12 }
 0x129   :  { %v187_v15 = vadd.f32 %v186_v13, %v182_v12  ;;  %v193_v16 = vrot.slane %v192_v14, 4 }
 0x12b   :  { %v188_v17 = vrot.slane %v187_v15, 2  ;;  %v194_v18 = vadd.f32 %v193_v16, %v192_v14 }
 0x12d   :  { %v189_v19 = vadd.f32 %v188_v17, %v187_v15  ;;  %v195_v20 = vrot.slane %v194_v18, 2 }
 0x12e   :  { %v184_v21 = vpop.f32.mrf.mxu1 }
 0x12f   :  { %v190_v22 = vrot.slane %v189_v19, 1  ;;  %v196_v23 = vadd.f32 %v195_v20, %v194_v18 }
 0x131   :  { %v191_v24 = vadd.f32 %v190_v22, %v189_v19  ;;  %v197_v25 = vrot.slane %v196_v23, 1 }
 0x133   :  { %v198_v26 = vadd.f32 %v197_v25, %v196_v23  ;;  %v199_v27 = vmul.f32 0.125, %v191_v24 }
 0x135   :  { %v200_v28 = vmul.f32 0.125, %v198_v26  ;;  %v201_v29 = vmul.f32 %v199_v27, %v199_v27 }
 0x137   :  { %v202_v30 = vsub.f32 %v200_v28, %v201_v29 }
 0x139   :  { %v203_v31 = vadd.f32 1e-05, %v202_v30 }
 0x13b   :  { %585 = vrsqrt.f32 %v203_v31  ;;  %vm210_vm3 = vweird.f32 %v203_v31 }
 0x141   :  { %v586_v32 = vpop.eup %585 }
 0x142   :  { %v205_v33 = vmul.f32 %v586_v32, %v203_v31  ;;  %vm211_vm2 = vweird.f32 %v586_v32 }
 0x143   :  { %vm212_vm4 = vmor %vm210_vm3, %vm211_vm2 }
 0x144   :  { %v206_v34 = vmul.f32 %v586_v32, %v205_v33 }
 0x146   :  { %v207_v35 = vmul.f32 0.5, %v206_v34 }
 0x148   :  { %v208_v36 = vsub.f32 1.5, %v207_v35 }
 0x14a   :  { %v209_v37 = vmul.f32 %v586_v32, %v208_v36 }
 0x14c   :  { %v213_v38 = vsel %vm212_vm4, %v586_v32, %v209_v37 }
 0x14d   :  { %v214_v39 = vmul.f32 %v213_v38, %v822_v0 }
 0x14f   :  { %v215_v40 = vmul.f32 %v214_v39, %v199_v27  ;;  %v220_v42 = vperm.slane %v214_v39, 0 }
 0x151   :  { %v217_v41 = vrot.slane %v215_v40, 7  ;;  %v221_v44 = vmul.f32 %v220_v42, %v182_v12 }
 0x153   :  { %v219_v43 = vsub.f32 %v822_v0, %v217_v41 }
 0x155   :  { %v222_v45 = vperm.slane %v219_v43, 1 }
 0x157   :  { %v223_v46 = vadd.f32 %v222_v45, %v221_v44 }
 0x159   :  { %v224_v47 = vmax.f32 %v223_v46, 0.0 }
 0x15a   :  { %763 = dma.done.wait [#allocation5 + $0x1], 1024 }
 0x15b   :  { %764 = vsyncadd [#allocation5 + $0x1], 4294966272  ;;  %v567_v48 = vld [vmem:[#allocation3 + $0x38] sm:$0xff]  ;;  %v566_v49 = vld [vmem:[#allocation3 + $0x30] sm:$0xff]  ;;  %v229_v56 = vpack.c.bf16 %v224_v47, %v224_v47 }
 0x15c   :  { %294 = vmatpush.bf16.msra.mxu2 %v567_v48  ;;  %v565_v50 = vld [vmem:[#allocation3 + $0x28] sm:$0xff]  ;;  %v564_v51 = vld [vmem:[#allocation3 + $0x20] sm:$0xff]  ;;  %v563_v52 = vld [vmem:[#allocation3 + $0x18] sm:$0xff] }
 0x15d   :  { %v562_v53 = vld [vmem:[#allocation3 + $0x10] sm:$0xff]  ;;  %v561_v54 = vld [vmem:[#allocation3 + $0x8] sm:$0xff]  ;;  %v560_v55 = vld [vmem:[#allocation3] sm:$0xff] }
 0x160   :  { %295 = vmatpush.bf16.msra.mxu2 %v566_v49 }
 0x164   :  { %296 = vmatpush.bf16.msra.mxu2 %v565_v50 }
 0x168   :  { %297 = vmatpush.bf16.msra.mxu2 %v564_v51 }
 0x16c   :  { %298 = vmatpush.bf16.msra.mxu2 %v563_v52 }
 0x170   :  { %299 = vmatpush.bf16.msra.mxu2 %v562_v53 }
 0x174   :  { %300 = vmatpush.bf16.msra.mxu2 %v561_v54 }
 0x178   :  { %301 = vmatpush.bf16.msra.mxu2 %v560_v55 }
 0x17b   :  { %302 = vmatmul.bf16.vlgmr.msra.gmra.mxu2 %v229_v56 }
 0x1fe   :  { %v303_v57 = vpop.f32.mrf.mxu2 }
 0x1ff   :  { %v307_v58 = vrot.slane %v303_v57, 4  ;;  %v313_v59 = vmul.f32 %v303_v57, %v303_v57 }
 0x201   :  { %v308_v60 = vadd.f32 %v307_v58, %v303_v57  ;;  %v314_v61 = vrot.slane %v313_v59, 4 }
 0x203   :  { %v309_v62 = vrot.slane %v308_v60, 2  ;;  %v315_v63 = vadd.f32 %v314_v61, %v313_v59 }
 0x205   :  { %v310_v1 = vadd.f32 %v309_v62, %v308_v60  ;;  %v316_v2 = vrot.slane %v315_v63, 2 }
 0x206   :  { %v305_v3 = vpop.f32.mrf.mxu2 }
 0x207   :  { %v311_v4 = vrot.slane %v310_v1, 1  ;;  %v317_v5 = vadd.f32 %v316_v2, %v315_v63 }
 0x209   :  { %v312_v6 = vadd.f32 %v311_v4, %v310_v1  ;;  %v318_v7 = vrot.slane %v317_v5, 1 }
 0x20b   :  { %v319_v8 = vadd.f32 %v318_v7, %v317_v5  ;;  %v320_v9 = vmul.f32 0.125, %v312_v6 }
 0x20d   :  { %v321_v10 = vmul.f32 0.125, %v319_v8  ;;  %v322_v11 = vmul.f32 %v320_v9, %v320_v9 }
 0x20f   :  { %v323_v12 = vsub.f32 %v321_v10, %v322_v11 }
 0x211   :  { %v324_v13 = vadd.f32 1e-05, %v323_v12 }
 0x213   :  { %587 = vrsqrt.f32 %v324_v13  ;;  %vm331_vm6 = vweird.f32 %v324_v13 }
 0x219   :  { %v588_v14 = vpop.eup %587 }
 0x21a   :  { %v326_v15 = vmul.f32 %v588_v14, %v324_v13  ;;  %vm332_vm5 = vweird.f32 %v588_v14 }
 0x21b   :  { %vm333_vm7 = vmor %vm331_vm6, %vm332_vm5 }
 0x21c   :  { %v327_v16 = vmul.f32 %v588_v14, %v326_v15 }
 0x21e   :  { %v328_v17 = vmul.f32 0.5, %v327_v16 }
 0x220   :  { %v329_v18 = vsub.f32 1.5, %v328_v17 }
 0x222   :  { %v330_v19 = vmul.f32 %v588_v14, %v329_v18 }
 0x224   :  { %v334_v20 = vsel %vm333_vm7, %v588_v14, %v330_v19 }
 0x225   :  { %v335_v21 = vmul.f32 %v334_v20, %v822_v0 }
 0x227   :  { %v336_v22 = vmul.f32 %v335_v21, %v320_v9  ;;  %v341_v24 = vperm.slane %v335_v21, 2 }
 0x229   :  { %v338_v23 = vrot.slane %v336_v22, 7  ;;  %v342_v26 = vmul.f32 %v341_v24, %v303_v57 }
 0x22b   :  { %v340_v25 = vsub.f32 %v822_v0, %v338_v23 }
 0x22d   :  { %v343_v27 = vperm.slane %v340_v25, 3 }
 0x22f   :  { %v344_v28 = vadd.f32 %v343_v27, %v342_v26 }
 0x231   :  { %v345_v29 = vmax.f32 %v344_v28, 0.0 }
 0x232   :  { %765 = dma.done.wait [#allocation5 + $0x2], 1024 }
 0x233   :  { %766 = vsyncadd [#allocation5 + $0x2], 4294966272  ;;  %v575_v30 = vld [vmem:[#allocation4 + $0x38] sm:$0xff]  ;;  %v574_v31 = vld [vmem:[#allocation4 + $0x30] sm:$0xff]  ;;  %v348_v38 = vpack.c.bf16 %v345_v29, %v345_v29  ;;  %v365_v39 = vperm.slane %v822_v0, 4  ;;  %s777_s4 = smov [#allocation12]  }
 0x234   :  { %414 = vmatpush.bf16.msra.mxu3 %v575_v30  ;;  %v573_v32 = vld [vmem:[#allocation4 + $0x28] sm:$0xff]  ;;  %v572_v33 = vld [vmem:[#allocation4 + $0x20] sm:$0xff]  ;;  %v571_v34 = vld [vmem:[#allocation4 + $0x18] sm:$0xff]  ;;  %s433_s5 = sshll.u32 %s777_s4, 4  ;;  %s435_s27 = sshll.u32 %s847_s6, 4  ;;  %s434_s5 = int_to_ptr.vmem [resolvable:$true] %s433_s5  ;;  %s436_s27 = int_to_ptr.hbm [resolvable:$true] %s435_s27 }
 0x235   :  { %v570_v35 = vld [vmem:[#allocation4 + $0x10] sm:$0xff]  ;;  %v569_v36 = vld [vmem:[#allocation4 + $0x8] sm:$0xff]  ;;  %v568_v37 = vld [vmem:[#allocation4] sm:$0xff] }
 0x238   :  { %415 = vmatpush.bf16.msra.mxu3 %v574_v31 }
 0x23c   :  { %416 = vmatpush.bf16.msra.mxu3 %v573_v32 }
 0x240   :  { %417 = vmatpush.bf16.msra.mxu3 %v572_v33 }
 0x244   :  { %418 = vmatpush.bf16.msra.mxu3 %v571_v34 }
 0x248   :  { %419 = vmatpush.bf16.msra.mxu3 %v570_v35 }
 0x24c   :  { %420 = vmatpush.bf16.msra.mxu3 %v569_v36 }
 0x250   :  { %421 = vmatpush.bf16.msra.mxu3 %v568_v37 }
 0x253   :  { %422 = vmatmul.bf16.vlgmr.msra.gmra.mxu3 %v348_v38 }
 0x2d6   :  { %v423_v40 = vpop.f32.mrf.mxu3 }
 0x2d7   :  { %v424_v41 = vadd.f32 %v423_v40, %v365_v39 }
 0x2d9   :  { %427 = vst [vmem:[#allocation12] sm:$0xff] %v424_v41 }
 0x2da   :  { %438 = dma.vmem_to_hbm [thread:$0]  %s434_s5, 128, %s436_s27, [#allocation8]  }
 0x2de   :  { %v425_v42 = vpop.f32.mrf.mxu3 }
 0x2df   :  { %767 = dma.done.wait [#allocation8], 128  }
 0x2e0   :  { %768 = vsyncadd [#allocation8], 4294967168 }
 0x2e1   :  { %443 = vsyncpa [#allocation7], 1 }
 0x2e2   :  { %444 = vsyncpa [#allocation10], 1 }
 0x2e3   :  { %445 = vsyncpa [#allocation8], 1 }
 0x2e4   :  { %446 = vsyncmov [#allocation5] }
 0x2e7   :  { %s447_s28 = vpop.sfrf %446 }
 0x2e8   :  { %p552_p0 = scmp.ne.s32.totalorder %s447_s28, 0 }
 0x2ea   :  { %451 = shalt.err (%p552_p0)  }
 0x2eb   :  { %453 = vsyncmov [#allocation5 + $0x1] }
 0x2ee   :  { %s454_s29 = vpop.sfrf %453 }
 0x2ef   :  { %p553_p1 = scmp.ne.s32.totalorder %s454_s29, 0 }
 0x2f1   :  { %458 = shalt.err (%p553_p1)  }
 0x2f2   :  { %460 = vsyncmov [#allocation5 + $0x2] }
 0x2f5   :  { %s461_s6 = vpop.sfrf %460 }
 0x2f6   :  { %p554_p2 = scmp.ne.s32.totalorder %s461_s6, 0 }
 0x2f8   :  { %465 = shalt.err (%p554_p2)  }

</bundles_post_ra>
